<compile_context>
chip_gen: v6e
topology: v6e:2x2x1
jax: 0.10.0
libtpu: 0.0.40
codegen_flags: <defaults>
</compile_context>

<pallas_src>
import math

import jax
import jax.numpy as jnp
from jax.experimental import pallas as pl
from jax.experimental.pallas import tpu as pltpu

# FastSpeechConfig values used by the module
FFT_CONV1D_KERNEL = (9, 1)
FFT_CONV1D_PADDING = (4, 0)

# problem sizes (small, consistent with the module)
B, T, D_IN, D_HID = 2, 16, 16, 32
EPS = 1e-5
SCALE = float(D_IN ** 0.5)  # ScaleNorm learnable scale, initialized to sqrt(d_in)

K1 = FFT_CONV1D_KERNEL[0]
P1 = FFT_CONV1D_PADDING[0]


def ffn_kernel(x_ref, xp_ref, w1_ref, b1_ref, w2_ref, b2_ref, o_ref):
    """Per-batch block (leading batch dim squeezed by the BlockSpecs).

       x_ref:  (T, D_IN)         raw input (residual)
       xp_ref: (Tp, D_IN)        zero-padded input, Tp = T + 2*P1 (padded in wrapper)
       w1_ref: (K1, D_IN, D_HID) conv1 weights (one (D_IN, D_HID) slab per tap)
       b1_ref: (1, D_HID)   w2_ref: (D_HID, D_IN)   b2_ref: (1, D_IN)
       o_ref:  (T, D_IN)
    """
    t = x_ref.shape[0]
    tp, din = xp_ref.shape
    dhid = w1_ref.shape[-1]

    xp = xp_ref[...].astype(jnp.float32)                        # (Tp, D_IN)

    # --- ScaleNorm: x * scale / clamp(||x||_2, eps) ------------------------
    # rsqrt of the squared norm clamped at EPS**2 == scale / clamp(norm, EPS).
    # Zero (padding) rows stay exactly zero, matching Conv1d zero padding.
    sumsq = jnp.sum(xp * xp, axis=-1, keepdims=True)            # (Tp, 1)
    xn = xp * (SCALE * jax.lax.rsqrt(jnp.maximum(sumsq, EPS * EPS)))

    # --- Conv1d(d_in -> d_hid, kernel=9, padding=4) ------------------------
    # Nine accumulating matmuls on sublane-rolled views of the padded
    # activations: rolled_k[r] = xn[r + k], so rows [0, T) of the accumulator
    # hold the valid conv outputs (rows >= T pick up wrapped values and are
    # discarded below).  Rolls hit the XLU slot; accumulation stays in f32.
    acc = jnp.zeros((tp, dhid), jnp.float32)
    for k in range(K1):                                         # static unroll
        xk = xn if k == 0 else pltpu.roll(xn, shift=tp - k, axis=0)
        acc = acc + jnp.dot(xk, w1_ref[k],
                            preferred_element_type=jnp.float32)

    h = jnp.maximum(acc + b1_ref[...], 0.0)                     # ReLU, (Tp, D_HID)
    h = h[:t, :]                                                # aligned start-0 slice

    # --- Conv1d(d_hid -> d_in, kernel=1) == plain matmul --------------------
    out = jnp.dot(h, w2_ref[...],
                  preferred_element_type=jnp.float32) + b2_ref[...]

    # TODO(synk): dropout omitted (eval-mode identity)
    o_ref[...] = (out + x_ref[...].astype(jnp.float32)).astype(o_ref.dtype)


def positionwise_ffn(x, w1, b1, w2, b2):
    """x: (B, T, D_IN) float32.  w1: (K1, D_IN, D_HID), b1: (1, D_HID),
    w2: (D_HID, D_IN), b2: (1, D_IN)."""
    Bx, Tx, Dx = x.shape
    Dh = w1.shape[-1]
    Tp = Tx + 2 * P1

    # Zero-pad T once in the wrapper (layout plumbing, not in-kernel work).
    xpad = jnp.pad(x, ((0, 0), (P1, P1), (0, 0)))

    flops = Bx * (2 * Tp * K1 * Dx * Dh + 2 * Tx * Dh * Dx + 10 * Tp * Dx)
    bytes_accessed = 4 * (2 * x.size + xpad.size + w1.size + b1.size
                          + w2.size + b2.size)
    cost = pl.CostEstimate(flops=flops,
                           transcendentals=Bx * Tp,
                           bytes_accessed=bytes_accessed)

    out = pl.pallas_call(
        ffn_kernel,
        out_shape=jax.ShapeDtypeStruct((Bx, Tx, Dx), x.dtype),
        grid_spec=pltpu.PrefetchScalarGridSpec(
            num_scalar_prefetch=0,
            # One grid step per batch element, marked "parallel" so v7x's two
            # TensorCores each take a batch; v5e/v6e run it as a short loop.
            grid=(Bx,),
            in_specs=[
                pl.BlockSpec((None, Tx, Dx), lambda b: (b, 0, 0)),
                pl.BlockSpec((None, Tp, Dx), lambda b: (b, 0, 0)),
                pl.BlockSpec((K1, Dx, Dh), lambda b: (0, 0, 0)),
                pl.BlockSpec((1, Dh), lambda b: (0, 0)),
                pl.BlockSpec((Dh, Dx), lambda b: (0, 0)),
                pl.BlockSpec((1, Dx), lambda b: (0, 0)),
            ],
            out_specs=pl.BlockSpec((None, Tx, Dx), lambda b: (b, 0, 0)),
        ),
        compiler_params=pltpu.CompilerParams(
            dimension_semantics=("parallel",)),
        cost_estimate=cost,
    )(x, xpad, w1, b1, w2, b2)

    return out


def reference(x, w1, b1, w2, b2):
    """Pure-JAX reference using lax.conv (NCW), mirroring the PyTorch module."""
    norm = jnp.linalg.norm(x, axis=-1, keepdims=True)
    xn = x * (SCALE / jnp.maximum(norm, EPS))
    xn_ncw = jnp.transpose(xn, (0, 2, 1))                      # (B, D_IN, T)
    # w1 is (K1, D_IN, D_HID) -> torch conv weight layout (D_HID, D_IN, K1)
    w1_oik = jnp.transpose(w1, (2, 1, 0))
    h = jax.lax.conv_general_dilated(
        xn_ncw, w1_oik, window_strides=(1,), padding=[(P1, P1)],
        dimension_numbers=("NCH", "OIH", "NCH"))
    h = jax.nn.relu(h + b1.reshape(1, D_HID, 1))
    w2_oik = jnp.transpose(w2, (1, 0))[:, :, None]             # (D_IN, D_HID, 1)
    o = jax.lax.conv_general_dilated(
        h, w2_oik, window_strides=(1,), padding=[(0, 0)],
        dimension_numbers=("NCH", "OIH", "NCH"))
    o = o + b2.reshape(1, D_IN, 1)
    return jnp.transpose(o, (0, 2, 1)) + x


if __name__ == "__main__":
    key = jax.random.PRNGKey(0)
    kx, k1, kb1, k2, kb2 = jax.random.split(key, 5)

    x = jax.random.normal(kx, (B, T, D_IN), dtype=jnp.float32)

    # Deterministic parameter init (same shapes as nn.Conv1d weights/biases).
    bound1 = 1.0 / math.sqrt(D_IN * K1)
    w1 = jax.random.uniform(k1, (K1, D_IN, D_HID), jnp.float32, -bound1, bound1)
    b1 = jax.random.uniform(kb1, (1, D_HID), jnp.float32, -bound1, bound1)
    bound2 = 1.0 / math.sqrt(D_HID * 1)
    w2 = jax.random.uniform(k2, (D_HID, D_IN), jnp.float32, -bound2, bound2)
    b2 = jax.random.uniform(kb2, (1, D_IN), jnp.float32, -bound2, bound2)

    out = jax.block_until_ready(positionwise_ffn(x, w1, b1, w2, b2))
    ref = jax.block_until_ready(reference(x, w1, b1, w2, b2))

    assert out.shape == (B, T, D_IN)
    # Slightly relaxed vs 1e-4 to absorb rsqrt-vs-(sqrt+div) rounding in ScaleNorm.
    assert jnp.allclose(out, ref, atol=2e-4, rtol=2e-4), "mismatch vs reference"

    print("KERNEL_OK")
</pallas_src>

<mosaic_0001>
module attributes {stable_mosaic.version = 11 : i64} {
  func.func @ffn_kernel(%arg0: i32, %arg1: memref<1x16x16xf32, #tpu.memory_space<vmem>>, %arg2: memref<1x24x16xf32, #tpu.memory_space<vmem>>, %arg3: memref<9x16x32xf32, #tpu.memory_space<vmem>>, %arg4: memref<1x32xf32, #tpu.memory_space<vmem>>, %arg5: memref<32x16xf32, #tpu.memory_space<vmem>>, %arg6: memref<1x16xf32, #tpu.memory_space<vmem>>, %arg7: memref<1x16x16xf32, #tpu.memory_space<vmem>>) attributes {dimension_semantics = [#tpu.dimension_semantics<parallel>], iteration_bounds = array<i64: 2>, scalar_prefetch = 0 : i64, scratch_operands = 0 : i64, tpu.core_type = #tpu.core_type<tc>, window_params = [{transform_indices = @transform_0, window_bounds = array<i64: 1, 16, 16>}, {transform_indices = @transform_1, window_bounds = array<i64: 1, 24, 16>}, {pipeline_mode = #tpu.pipeline_mode<synchronous>, transform_indices = @transform_2, window_bounds = array<i64: 9, 16, 32>}, {pipeline_mode = #tpu.pipeline_mode<synchronous>, transform_indices = @transform_3, window_bounds = array<i64: 1, 32>}, {pipeline_mode = #tpu.pipeline_mode<synchronous>, transform_indices = @transform_4, window_bounds = array<i64: 32, 16>}, {pipeline_mode = #tpu.pipeline_mode<synchronous>, transform_indices = @transform_5, window_bounds = array<i64: 1, 16>}, {transform_indices = @transform_6, window_bounds = array<i64: 1, 16, 16>}]} {
    %c0 = arith.constant 0 : index
    %c0_0 = arith.constant 0 : index
    %c0_1 = arith.constant 0 : index
    %0 = vector.load %arg2[%c0, %c0_0, %c0_1] : memref<1x24x16xf32, #tpu.memory_space<vmem>>, vector<1x24x16xf32>
    %1 = vector.shape_cast %0 : vector<1x24x16xf32> to vector<24x16xf32>
    %2 = arith.mulf %1, %1 : vector<24x16xf32>
    %cst = arith.constant dense<0.000000e+00> : vector<24xf32>
    %3 = vector.multi_reduction <add>, %2, %cst [1] : vector<24x16xf32> to vector<24xf32>
    %4 = vector.shape_cast %3 : vector<24xf32> to vector<24x1xf32>
    %cst_2 = arith.constant 1.000000e-10 : f32
    %5 = vector.broadcast %cst_2 : f32 to vector<24x1xf32>
    %6 = arith.maximumf %4, %5 : vector<24x1xf32>
    %7 = math.rsqrt %6 : vector<24x1xf32>
    %cst_3 = arith.constant 4.000000e+00 : f32
    %8 = vector.broadcast %cst_3 : f32 to vector<24x1xf32>
    %9 = arith.mulf %8, %7 : vector<24x1xf32>
    %10 = vector.broadcast %9 : vector<24x1xf32> to vector<24x16xf32>
    %11 = arith.mulf %1, %10 : vector<24x16xf32>
    %cst_4 = arith.constant 0.000000e+00 : f32
    %12 = vector.broadcast %cst_4 : f32 to vector<24x32xf32>
    %c0_5 = arith.constant 0 : index
    %c0_6 = arith.constant 0 : index
    %c0_7 = arith.constant 0 : index
    %13 = vector.load %arg3[%c0_5, %c0_6, %c0_7] : memref<9x16x32xf32, #tpu.memory_space<vmem>>, vector<1x16x32xf32>
    %14 = vector.shape_cast %13 : vector<1x16x32xf32> to vector<16x32xf32>
    %cst_8 = arith.constant dense<0.000000e+00> : vector<24x32xf32>
    %15 = tpu.matmul %11, %14, %cst_8 {dimension_numbers = #tpu.dot_dimension_numbers<[1], [0], [0], [1], [0, 0, 1, 1], [], []>} : vector<24x16xf32>, vector<16x32xf32>, vector<24x32xf32> -> vector<24x32xf32>
    %16 = arith.addf %12, %15 : vector<24x32xf32>
    %c23_i32 = arith.constant 23 : i32
    %17 = tpu.dynamic_rotate %11 by %c23_i32 dim 0 : vector<24x16xf32>, i32 -> vector<24x16xf32>
    %c1 = arith.constant 1 : index
    %c0_9 = arith.constant 0 : index
    %c0_10 = arith.constant 0 : index
    %18 = vector.load %arg3[%c1, %c0_9, %c0_10] : memref<9x16x32xf32, #tpu.memory_space<vmem>>, vector<1x16x32xf32>
    %19 = vector.shape_cast %18 : vector<1x16x32xf32> to vector<16x32xf32>
    %cst_11 = arith.constant dense<0.000000e+00> : vector<24x32xf32>
    %20 = tpu.matmul %17, %19, %cst_11 {dimension_numbers = #tpu.dot_dimension_numbers<[1], [0], [0], [1], [0, 0, 1, 1], [], []>} : vector<24x16xf32>, vector<16x32xf32>, vector<24x32xf32> -> vector<24x32xf32>
    %21 = arith.addf %16, %20 : vector<24x32xf32>
    %c22_i32 = arith.constant 22 : i32
    %22 = tpu.dynamic_rotate %11 by %c22_i32 dim 0 : vector<24x16xf32>, i32 -> vector<24x16xf32>
    %c2 = arith.constant 2 : index
    %c0_12 = arith.constant 0 : index
    %c0_13 = arith.constant 0 : index
    %23 = vector.load %arg3[%c2, %c0_12, %c0_13] : memref<9x16x32xf32, #tpu.memory_space<vmem>>, vector<1x16x32xf32>
    %24 = vector.shape_cast %23 : vector<1x16x32xf32> to vector<16x32xf32>
    %cst_14 = arith.constant dense<0.000000e+00> : vector<24x32xf32>
    %25 = tpu.matmul %22, %24, %cst_14 {dimension_numbers = #tpu.dot_dimension_numbers<[1], [0], [0], [1], [0, 0, 1, 1], [], []>} : vector<24x16xf32>, vector<16x32xf32>, vector<24x32xf32> -> vector<24x32xf32>
    %26 = arith.addf %21, %25 : vector<24x32xf32>
    %c21_i32 = arith.constant 21 : i32
    %27 = tpu.dynamic_rotate %11 by %c21_i32 dim 0 : vector<24x16xf32>, i32 -> vector<24x16xf32>
    %c3 = arith.constant 3 : index
    %c0_15 = arith.constant 0 : index
    %c0_16 = arith.constant 0 : index
    %28 = vector.load %arg3[%c3, %c0_15, %c0_16] : memref<9x16x32xf32, #tpu.memory_space<vmem>>, vector<1x16x32xf32>
    %29 = vector.shape_cast %28 : vector<1x16x32xf32> to vector<16x32xf32>
    %cst_17 = arith.constant dense<0.000000e+00> : vector<24x32xf32>
    %30 = tpu.matmul %27, %29, %cst_17 {dimension_numbers = #tpu.dot_dimension_numbers<[1], [0], [0], [1], [0, 0, 1, 1], [], []>} : vector<24x16xf32>, vector<16x32xf32>, vector<24x32xf32> -> vector<24x32xf32>
    %31 = arith.addf %26, %30 : vector<24x32xf32>
    %c20_i32 = arith.constant 20 : i32
    %32 = tpu.dynamic_rotate %11 by %c20_i32 dim 0 : vector<24x16xf32>, i32 -> vector<24x16xf32>
    %c4 = arith.constant 4 : index
    %c0_18 = arith.constant 0 : index
    %c0_19 = arith.constant 0 : index
    %33 = vector.load %arg3[%c4, %c0_18, %c0_19] : memref<9x16x32xf32, #tpu.memory_space<vmem>>, vector<1x16x32xf32>
    %34 = vector.shape_cast %33 : vector<1x16x32xf32> to vector<16x32xf32>
    %cst_20 = arith.constant dense<0.000000e+00> : vector<24x32xf32>
    %35 = tpu.matmul %32, %34, %cst_20 {dimension_numbers = #tpu.dot_dimension_numbers<[1], [0], [0], [1], [0, 0, 1, 1], [], []>} : vector<24x16xf32>, vector<16x32xf32>, vector<24x32xf32> -> vector<24x32xf32>
    %36 = arith.addf %31, %35 : vector<24x32xf32>
    %c19_i32 = arith.constant 19 : i32
    %37 = tpu.dynamic_rotate %11 by %c19_i32 dim 0 : vector<24x16xf32>, i32 -> vector<24x16xf32>
    %c5 = arith.constant 5 : index
    %c0_21 = arith.constant 0 : index
    %c0_22 = arith.constant 0 : index
    %38 = vector.load %arg3[%c5, %c0_21, %c0_22] : memref<9x16x32xf32, #tpu.memory_space<vmem>>, vector<1x16x32xf32>
    %39 = vector.shape_cast %38 : vector<1x16x32xf32> to vector<16x32xf32>
    %cst_23 = arith.constant dense<0.000000e+00> : vector<24x32xf32>
    %40 = tpu.matmul %37, %39, %cst_23 {dimension_numbers = #tpu.dot_dimension_numbers<[1], [0], [0], [1], [0, 0, 1, 1], [], []>} : vector<24x16xf32>, vector<16x32xf32>, vector<24x32xf32> -> vector<24x32xf32>
    %41 = arith.addf %36, %40 : vector<24x32xf32>
    %c18_i32 = arith.constant 18 : i32
    %42 = tpu.dynamic_rotate %11 by %c18_i32 dim 0 : vector<24x16xf32>, i32 -> vector<24x16xf32>
    %c6 = arith.constant 6 : index
    %c0_24 = arith.constant 0 : index
    %c0_25 = arith.constant 0 : index
    %43 = vector.load %arg3[%c6, %c0_24, %c0_25] : memref<9x16x32xf32, #tpu.memory_space<vmem>>, vector<1x16x32xf32>
    %44 = vector.shape_cast %43 : vector<1x16x32xf32> to vector<16x32xf32>
    %cst_26 = arith.constant dense<0.000000e+00> : vector<24x32xf32>
    %45 = tpu.matmul %42, %44, %cst_26 {dimension_numbers = #tpu.dot_dimension_numbers<[1], [0], [0], [1], [0, 0, 1, 1], [], []>} : vector<24x16xf32>, vector<16x32xf32>, vector<24x32xf32> -> vector<24x32xf32>
    %46 = arith.addf %41, %45 : vector<24x32xf32>
    %c17_i32 = arith.constant 17 : i32
    %47 = tpu.dynamic_rotate %11 by %c17_i32 dim 0 : vector<24x16xf32>, i32 -> vector<24x16xf32>
    %c7 = arith.constant 7 : index
    %c0_27 = arith.constant 0 : index
    %c0_28 = arith.constant 0 : index
    %48 = vector.load %arg3[%c7, %c0_27, %c0_28] : memref<9x16x32xf32, #tpu.memory_space<vmem>>, vector<1x16x32xf32>
    %49 = vector.shape_cast %48 : vector<1x16x32xf32> to vector<16x32xf32>
    %cst_29 = arith.constant dense<0.000000e+00> : vector<24x32xf32>
    %50 = tpu.matmul %47, %49, %cst_29 {dimension_numbers = #tpu.dot_dimension_numbers<[1], [0], [0], [1], [0, 0, 1, 1], [], []>} : vector<24x16xf32>, vector<16x32xf32>, vector<24x32xf32> -> vector<24x32xf32>
    %51 = arith.addf %46, %50 : vector<24x32xf32>
    %c16_i32 = arith.constant 16 : i32
    %52 = tpu.dynamic_rotate %11 by %c16_i32 dim 0 : vector<24x16xf32>, i32 -> vector<24x16xf32>
    %c8 = arith.constant 8 : index
    %c0_30 = arith.constant 0 : index
    %c0_31 = arith.constant 0 : index
    %53 = vector.load %arg3[%c8, %c0_30, %c0_31] : memref<9x16x32xf32, #tpu.memory_space<vmem>>, vector<1x16x32xf32>
    %54 = vector.shape_cast %53 : vector<1x16x32xf32> to vector<16x32xf32>
    %cst_32 = arith.constant dense<0.000000e+00> : vector<24x32xf32>
    %55 = tpu.matmul %52, %54, %cst_32 {dimension_numbers = #tpu.dot_dimension_numbers<[1], [0], [0], [1], [0, 0, 1, 1], [], []>} : vector<24x16xf32>, vector<16x32xf32>, vector<24x32xf32> -> vector<24x32xf32>
    %56 = arith.addf %51, %55 : vector<24x32xf32>
    %c0_33 = arith.constant 0 : index
    %c0_34 = arith.constant 0 : index
    %57 = vector.load %arg4[%c0_33, %c0_34] : memref<1x32xf32, #tpu.memory_space<vmem>>, vector<1x32xf32>
    %58 = vector.broadcast %57 : vector<1x32xf32> to vector<24x32xf32>
    %59 = arith.addf %56, %58 : vector<24x32xf32>
    %cst_35 = arith.constant 0.000000e+00 : f32
    %60 = vector.broadcast %cst_35 : f32 to vector<24x32xf32>
    %61 = arith.maximumf %59, %60 : vector<24x32xf32>
    %62 = vector.extract_strided_slice %61 {offsets = [0, 0], sizes = [16, 32], strides = [1, 1]} : vector<24x32xf32> to vector<16x32xf32>
    %c0_36 = arith.constant 0 : index
    %c0_37 = arith.constant 0 : index
    %63 = vector.load %arg5[%c0_36, %c0_37] : memref<32x16xf32, #tpu.memory_space<vmem>>, vector<32x16xf32>
    %cst_38 = arith.constant dense<0.000000e+00> : vector<16x16xf32>
    %64 = tpu.matmul %62, %63, %cst_38 {dimension_numbers = #tpu.dot_dimension_numbers<[1], [0], [0], [1], [0, 0, 1, 1], [], []>} : vector<16x32xf32>, vector<32x16xf32>, vector<16x16xf32> -> vector<16x16xf32>
    %c0_39 = arith.constant 0 : index
    %c0_40 = arith.constant 0 : index
    %65 = vector.load %arg6[%c0_39, %c0_40] : memref<1x16xf32, #tpu.memory_space<vmem>>, vector<1x16xf32>
    %66 = vector.broadcast %65 : vector<1x16xf32> to vector<16x16xf32>
    %67 = arith.addf %64, %66 : vector<16x16xf32>
    %c0_41 = arith.constant 0 : index
    %c0_42 = arith.constant 0 : index
    %c0_43 = arith.constant 0 : index
    %68 = vector.load %arg1[%c0_41, %c0_42, %c0_43] : memref<1x16x16xf32, #tpu.memory_space<vmem>>, vector<1x16x16xf32>
    %69 = vector.shape_cast %68 : vector<1x16x16xf32> to vector<16x16xf32>
    %70 = arith.addf %67, %69 : vector<16x16xf32>
    %c0_44 = arith.constant 0 : index
    %c0_45 = arith.constant 0 : index
    %c0_46 = arith.constant 0 : index
    %71 = vector.load %arg7[%c0_44, %c0_45, %c0_46] : memref<1x16x16xf32, #tpu.memory_space<vmem>>, vector<1x16x16xf32>
    %72 = vector.shape_cast %71 : vector<1x16x16xf32> to vector<16x16xf32>
    %73 = vector.shape_cast %70 : vector<16x16xf32> to vector<1x16x16xf32>
    tpu.vector_store %arg7[%c0_44, %c0_45, %c0_46], %73 {strides = array<i32>} : memref<1x16x16xf32, #tpu.memory_space<vmem>>, vector<1x16x16xf32>,
    return
  }
  func.func @transform_0(%arg0: i32) -> (i32, i32, i32) {
    %c0_i32 = arith.constant 0 : i32
    %c0_i32_0 = arith.constant 0 : i32
    %c0_i32_1 = arith.constant 0 : i32
    return %arg0, %c0_i32, %c0_i32_0 : i32, i32, i32
  }
  func.func @transform_1(%arg0: i32) -> (i32, i32, i32) {
    %c0_i32 = arith.constant 0 : i32
    %c0_i32_0 = arith.constant 0 : i32
    %c0_i32_1 = arith.constant 0 : i32
    return %arg0, %c0_i32, %c0_i32_0 : i32, i32, i32
  }
  func.func @transform_2(%arg0: i32) -> (i32, i32, i32) {
    %c0_i32 = arith.constant 0 : i32
    %c0_i32_0 = arith.constant 0 : i32
    %c0_i32_1 = arith.constant 0 : i32
    %c0_i32_2 = arith.constant 0 : i32
    return %c0_i32, %c0_i32_0, %c0_i32_1 : i32, i32, i32
  }
  func.func @transform_3(%arg0: i32) -> (i32, i32) {
    %c0_i32 = arith.constant 0 : i32
    %c0_i32_0 = arith.constant 0 : i32
    %c0_i32_1 = arith.constant 0 : i32
    return %c0_i32, %c0_i32_0 : i32, i32
  }
  func.func @transform_4(%arg0: i32) -> (i32, i32) {
    %c0_i32 = arith.constant 0 : i32
    %c0_i32_0 = arith.constant 0 : i32
    %c0_i32_1 = arith.constant 0 : i32
    return %c0_i32, %c0_i32_0 : i32, i32
  }
  func.func @transform_5(%arg0: i32) -> (i32, i32) {
    %c0_i32 = arith.constant 0 : i32
    %c0_i32_0 = arith.constant 0 : i32
    %c0_i32_1 = arith.constant 0 : i32
    return %c0_i32, %c0_i32_0 : i32, i32
  }
  func.func @transform_6(%arg0: i32) -> (i32, i32, i32) {
    %c0_i32 = arith.constant 0 : i32
    %c0_i32_0 = arith.constant 0 : i32
    %c0_i32_1 = arith.constant 0 : i32
    return %arg0, %c0_i32, %c0_i32_0 : i32, i32, i32
  }
}

</mosaic_0001>

<bundles_post_ra>
// kernel: tpu_custom_call.1
= control target key start
LH: loop header
LB: loop body
LE: loop exit
PB: predicated region body
PF: predicated region fallthrough
CT: control target
= control target key end

     0   :  { %11 = vsyncpa [#allocation3], 0  ;;  %s2155_s0 = inlined_call_operand.vmem [shape: f32[2,16,16], index: 0, kind: input, shape index: {}]   ;;  %s2156_s1 = inlined_call_operand.vmem [shape: f32[2,24,16], index: 1, kind: input, shape index: {}]   ;;  %s2157_s2 = inlined_call_operand.hbm [shape: f32[9,16,32], index: 2, kind: input, shape index: {}]   ;;  %s2158_s3 = inlined_call_operand.vmem [shape: f32[1,32], index: 3, kind: input, shape index: {}]   ;;  %s2159_s4 = inlined_call_operand.vmem [shape: f32[32,16], index: 4, kind: input, shape index: {}]   ;;  %s2160_s5 = inlined_call_operand.vmem [shape: f32[1,16], index: 5, kind: input, shape index: {}]   ;;  %s2161_s6 = inlined_call_operand.hbm [shape: f32[2,16,16], index: 6, kind: output, shape index: {}]  }
   0x1   :  { %12 = vsyncpa [#allocation4], 0 }
   0x2   :  { %14 = vsyncpa [#allocation4 + $0x1], 0  ;;  %s1826_s21 = smov 0   ;;  %s1828_s22 = smov 0  }
   0x3   :  { %s1830_s23 = smov 0   ;;  %s1832_s24 = smov 0  }
   0x4 LB: > { %s1847_s25 = sadd.s32 4294967295, %s1781_s24   ;;  %s1397_s26 = sadd.s32 4294967294, %s1781_s24   ;;  %s1781_s24 = sphi %s1832_s24, %s2169_s24   ;;  %s1777_s23 = sphi %s1830_s23, %s2168_s23   ;;  %s1773_s22 = sphi %s1828_s22, %s2167_s22   ;;  %s1769_s21 = sphi %s1826_s21, %s2166_s21  }
   0x5   : > { %s1851_s27 = sadd.s32 1, %s1781_s24   ;;  %s163_s28 = sadd.s32 1, %s1777_s23 }
   0x6   : > { %s160_s29 = ssub.s32 %s1781_s24, %s1851_s27  ;;  %p173_p0 = scmp.ne.s32.totalorder %s1777_s23, %s1773_s22 }
   0x7   : > { %p161_p1 = scmp.eq.s32.totalorder %s160_s29, 0  ;;  %p174_p2 = scmp.eq.s32.totalorder %s1847_s25, 1 }
   0x8   : > { %p179_p3 = scmp.ne.s32.totalorder %s1773_s22, %s1769_s21  ;;  %p180_p4 = scmp.eq.s32.totalorder %s1397_s26, 1 }
   0x9   : > { %s1862_s30 = scalar_select %p161_p1, %s1777_s23, %s163_s28  }
   0xa   : > { %p1864_p5 = por %p174_p2, %p173_p0  ;;  %p1868_p6 = por %p180_p4, %p179_p3 }
   0xb   : > { %p1398_p7 = scmp.ge.s32.totalorder %s1781_s24, 1  ;;  %p187_p8 = scmp.lt.s32.totalorder %s1781_s24, 3 }
   0xc   : > { %s2163_s8 = scalar_select %p1868_p6, 1, 0 }
   0xd   : > { %p1643_p9 = scmp.eq.s32.totalorder %s1847_s25, 0  ;;  %p1875_p10 = pnand %p1398_p7, %p187_p8 }
   0xe   : > { %s1783_s10 = smov [#allocation2]  }
   0xf   : > { %s199_s11 = sshll.u32 %s1783_s10, 4  ;;  %p1635_p11 = pneg %p1875_p10  ;;  %s200_s11 = int_to_ptr.vmem [resolvable:$true] %s199_s11 }
  0x10   : > { %s1702_s12 = scalar_lea.vmem %s200_s11, 2304  ;;  %p1710_p3 = scmp.lt.s32.totalorder %s200_s11, %s200_s11 }
  0x11   : > { %p1636_p12 = pnand %p1643_p9, %p1635_p11  ;;  %p1703_p0 = scmp.ne.s32.totalorder %s200_s11, %s1702_s12 }
  0x12   : > { %p1711_p4 = scmp.lt.s32.totalorder %s1702_s12, %s1702_s12 }
  0x13   : > { %p1693_p13 = pneg %p1636_p12 }
  0x14   : > { %p1712_p6 = por %p1711_p4, %p1710_p3 }
  0x15   : > { %p1705_p1 = pnand %p1703_p0, %p1693_p13 }
  0x17   : > { %p1706_p2 = pneg %p1705_p1 }
  0x19   : > { %p1713_p7 = pnand %p1712_p6, %p1706_p2 }
  0x1b   : > { %1716 = shalt.err (!%p1713_p7)
}
  0x1c   : > { %s1784_s13 = smov 128   ;;  %s1785_s14 = smov 8  }
  0x1d   : > { %1638 = dma.hbm_to_vmem [thread:$0]  (!%p1636_p12), %s2157_s2, 2304, %s200_s11, [#allocation3], %s1784_s13, %s1784_s13, %s1785_s14  }
  0x1e   : > { %240 = sbr.rel (%p1875_p10) target bundleno = 672 (0x2a0), region = 44 }
  0x23   : > { %1760 = dma.done.wait (%p1643_p9), [#allocation3], 2304  }
  0x24   : > { %1762 = vsyncadd (%p1643_p9), [#allocation3], 4294964992  ;;  %p275_p8 = scmp.lt.s32.totalorder %s1847_s25, 1  ;;  %vm291_vm0 = vcmask 130048   ;;  %v1786_v9 = vmov 0.0   ;;  %v326_v10 = vld [vmem:[#allocation2 + $0x18] sm:$0xff]  ;;  %v318_v18 = vlaneseq }
  0x25   : > { %1624 = vmatprep.subr.mxu1 %v1786_v9  ;;  %1496 = vmatprep.subr.mxu0 %v1786_v9  ;;  %v325_v11 = vld [vmem:[#allocation2 + $0x10] sm:$0xff]  ;;  %vm1787_vm1 = vmmov 0   ;;  %v314_v31 = vld [vmem:[#allocation2 + $0x8] sm:$0xff]  ;;  %v313_v33 = vld [vmem:[#allocation2] sm:$0xff]  ;;  %vm1209_vm9 = vcmask 261120   ;;  %s1444_s11 = sshll.u32 %s1847_s25, 8 }
  0x26   : > { %s1894_s17 = scalar_select %p275_p8, %s1847_s25, 1  ;;  %1626 = vmatpush3.msra.mxu1 %v326_v10  ;;  %1497 = vmatpush3.msra.mxu0 %v326_v10  ;;  %v1913_v22 = vshrl.u32 %v318_v18, 7  ;;  %v512_v35 = vld [vmem:[#allocation2 + $0x28] sm:$0xff]  ;;  %v612_v37 = vld [vmem:[#allocation2 + $0x38] sm:$0xff]  ;;  %v511_v38 = vld [vmem:[#allocation2 + $0x20] sm:$0xff] }
  0x27   : > { %1625 = vmatprep.subr.mxu1 %v1786_v9  ;;  %1498 = vmatprep.subr.mxu0 %v1786_v9  ;;  %v611_v42 = vld [vmem:[#allocation2 + $0x30] sm:$0xff]  ;;  %v712_v43 = vld [vmem:[#allocation2 + $0x48] sm:$0xff]  ;;  %v711_v48 = vld [vmem:[#allocation2 + $0x40] sm:$0xff]  ;;  %s2109_s15 = scalar_lea.hbm %s2161_s6, %s1444_s11 }
  0x28   : > { %s1628_s18 = smul.u32 24, %s1894_s17  ;;  %1627 = vmatpush3.msra.mxu1 %v325_v11  ;;  %1506 = vmatprep.mubr.msk.f32.mxu1 %vm1787_vm1, %v1786_v9  ;;  %vm320_vm2 = vcmp.lt.s32.totalorder %v1913_v22, 7  ;;  %vm506_vm3 = vcmp.lt.s32.totalorder %v1913_v22, 6  ;;  %vm606_vm4 = vcmp.lt.s32.totalorder %v1913_v22, 5  ;;  %v812_v51 = vld [vmem:[#allocation2 + $0x58] sm:$0xff]  ;;  %v811_v55 = vld [vmem:[#allocation2 + $0x50] sm:$0xff] }
  0x29   : > { %1509 = vmatprep.subr.mxu1 %v1786_v9  ;;  %1499 = vmatpush3.msra.mxu0 %v325_v11  ;;  %vm706_vm5 = vcmp.lt.s32.totalorder %v1913_v22, 4  ;;  %v912_v58 = vld [vmem:[#allocation2 + $0x68] sm:$0xff]  ;;  %vm806_vm6 = vcmp.lt.s32.totalorder %v1913_v22, 3  ;;  %vm906_vm7 = vcmp.lt.s32.totalorder %v1913_v22, 2  ;;  %vm1006_vm8 = vcmp.lt.s32.totalorder %v1913_v22, 1  ;;  %v1201_v22 = vld [vmem:[%s2159_s4 + $0x18] sm:$0xff] }
  0x2a   : > { %s284_s26 = scalar_lea.vmem %s2156_s1, %s1628_s18  ;;  %1500 = vmatprep.mubr.msk.f32.mxu0 %vm1787_vm1, %v1786_v9  ;;  %1522 = vmatprep.subr.mxu0 %v1786_v9  ;;  %v1105_v11 = vld [vmem:[#allocation2 + $0x88] sm:$0xff]  ;;  %s272_s18 = sand.u32 1, %s1773_s22  }
  0x2b   : > { %v287_v0 = vld [vmem:[%s284_s26 + $0x10] sm:$0xff]  ;;  %v285_v1 = vld [vmem:[%s284_s26] sm:$0xff]  ;;  %v286_v2 = vld [vmem:[%s284_s26 + $0x8] sm:$0xff]  ;;  %s1443_s19 = sshll.u32 %s1894_s17, 4  ;;  %s1403_s20 = sshll.u32 %s272_s18, 4 }
  0x2c   : > { %v290_v3 = vmul.f32 %v287_v0, %v287_v0  ;;  %v288_v4 = vmul.f32 %v285_v1, %v285_v1  ;;  %v289_v5 = vmul.f32 %v286_v2, %v286_v2  ;;  %s279_s29 = scalar_lea.vmem %s2155_s0, %s1443_s19  ;;  %s274_s12 = scalar_lea.vmem [#allocation5], %s1403_s20 }
  0x2d   : > { %s1311_s13 = sshll.u32 %s274_s12, 4  ;;  %s2115_s25 = scalar_lea.sflag [#allocation4], %s272_s18  ;;  %s2111_s13 = int_to_ptr.vmem [resolvable:$true] %s1311_s13 }
  0x2e   : > { %v298_v6 = vsel %vm291_vm0, %v290_v3, 0.0  ;;  %v292_v7 = vsel %vm291_vm0, %v288_v4, 0.0  ;;  %v295_v8 = vsel %vm291_vm0, %v289_v5, 0.0  ;;  %v1012_v3 = vld [vmem:[#allocation2 + $0x78] sm:$0xff]  ;;  %s1717_s16 = scalar_lea.vmem %s2111_s13, 256  ;;  %s1788_s19 = smov [#allocation5]  }
  0x2f   : > { %299 = vadd.xlane.f32.xlu1 %v298_v6  ;;  %293 = vadd.xlane.f32.xlu0 %v292_v7  ;;  %v1011_v7 = vld [vmem:[#allocation2 + $0x70] sm:$0xff]  ;;  %p1718_p6 = scmp.ne.s32.totalorder %s2111_s13, %s1717_s16  ;;  %s1721_s20 = sshll.u32 %s1788_s19, 4  ;;  %s1722_s20 = int_to_ptr.vmem [resolvable:$false] %s1721_s20 }
  0x30   : > { %s1723_s26 = scalar_lea.vmem %s1722_s20, 512  ;;  %p1724_p11 = scmp.lt.s32.totalorder %s2111_s13, %s1722_s20 }
  0x31   : > { %p1719_p9 = pnand %p1718_p6, %p1864_p5  ;;  %p1725_p12 = scmp.lt.s32.totalorder %s1723_s26, %s1717_s16 }
  0x33   : > { %296 = vadd.xlane.f32.xlu0 %v295_v8  ;;  %p1720_p10 = pneg %p1719_p9  ;;  %p1726_p13 = por %p1725_p12, %p1724_p11 }
  0x35   : > { %p1727_p0 = pnand %p1726_p13, %p1720_p10 }
  0xb8   : > { %v300_v12 = vpop.xlane.xlu1 %299  ;;  %v294_v13 = vpop.xlane.xlu0 %293 }
  0xb9   : > { %v303_v14 = vmax.f32 %v300_v12, 1e-10  ;;  %v301_v15 = vmax.f32 %v294_v13, 1e-10 }
  0xbb   : > { %1685 = vrsqrt.f32 %v303_v14 }
  0xbc   : > { %1687 = vrsqrt.f32 %v301_v15  ;;  %v297_v16 = vpop.xlane.xlu0 %296 }
  0xbd   : > { %v302_v17 = vmax.f32 %v297_v16, 1e-10 }
  0xbf   : > { %1689 = vrsqrt.f32 %v302_v17  ;;  %v1104_v17 = vld [vmem:[#allocation2 + $0x80] sm:$0xff] }
  0xc8   : > { %v1686_v19 = vpop.eup %1685 }
  0xc9   : > { %v1688_v20 = vpop.eup %1687  ;;  %v309_v21 = vmul.f32 4.0, %v1686_v19 }
  0xca   : > { %v307_v23 = vmul.f32 4.0, %v1688_v20 }
  0xcb   : > { %v1915_v24 = vmul.f32 %v309_v21, %v287_v0  ;;  %v911_v0 = vld [vmem:[#allocation2 + $0x60] sm:$0xff] }
  0xcc   : > { %v1690_v25 = vpop.eup %1689  ;;  %v1917_v26 = vmul.f32 %v307_v23, %v285_v1 }
  0xcd   : > { %v308_v27 = vmul.f32 4.0, %v1690_v25  ;;  %v317_v28 = vrot.slane %v1915_v24, 1  ;;  %v505_v46 = vrot.slane %v1915_v24, 2  ;;  %v605_v52 = vrot.slane %v1915_v24, 3 }
  0xce   : > { %v315_v29 = vrot.slane %v1917_v26, 1  ;;  %v503_v41 = vrot.slane %v1917_v26, 2  ;;  %v603_v47 = vrot.slane %v1917_v26, 3  ;;  %v703_v57 = vrot.slane %v1917_v26, 4 }
  0xcf   : > { %v1922_v30 = vmul.f32 %v308_v27, %v286_v2  ;;  %v705_v62 = vrot.slane %v1915_v24, 4  ;;  %v803_v63 = vrot.slane %v1917_v26, 5  ;;  %v805_v4 = vrot.slane %v1915_v24, 5  ;;  %v1200_v27 = vld [vmem:[%s2159_s4 + $0x10] sm:$0xff] }
  0xd0   : > { %v323_v32 = vsel %vm320_vm2, %v317_v28, %v315_v29  ;;  %v509_v53 = vsel %vm506_vm3, %v505_v46, %v503_v41  ;;  %v609_v60 = vsel %vm606_vm4, %v605_v52, %v603_v47  ;;  %v903_v10 = vrot.slane %v1917_v26, 6 }
  0xd1   : > { %1507 = vmatmul.mubr.msk.f32.vlgmr.msra.gmra.mxu1 %vm291_vm0, %v323_v32  ;;  %v316_v34 = vrot.slane %v1922_v30, 1  ;;  %v504_v40 = vrot.slane %v1922_v30, 2  ;;  %v604_v45 = vrot.slane %v1922_v30, 3  ;;  %v704_v54 = vrot.slane %v1922_v30, 4 }
  0xd2   : > { %1510 = vmatpush3.msra.mxu1 %v314_v31  ;;  %1513 = vmatprep.mubr.msk.f32.mxu1 %vm1787_vm1, %v1786_v9  ;;  %v804_v61 = vrot.slane %v1922_v30, 5  ;;  %v709_v5 = vsel %vm706_vm5, %v705_v62, %v703_v57  ;;  %v904_v6 = vrot.slane %v1922_v30, 6  ;;  %v809_v13 = vsel %vm806_vm6, %v805_v4, %v803_v63 }
  0xd3   : > { %1511 = vmatprep.subr.mxu1 %v1786_v9  ;;  %v322_v36 = vsel %vm320_vm2, %v315_v29, %v316_v34  ;;  %v321_v39 = vsel %vm320_vm2, %v316_v34, %v317_v28  ;;  %v508_v44 = vsel %vm506_vm3, %v503_v41, %v504_v40  ;;  %v507_v49 = vsel %vm506_vm3, %v504_v40, %v505_v46 }
  0xd4   : > { %1512 = vmatpush3.msra.mxu1 %v313_v33  ;;  %1501 = vmatmul.mubr.msk.f32.vlgmr.msra.gmra.mxu0 %vm291_vm0, %v322_v36  ;;  %v608_v50 = vsel %vm606_vm4, %v603_v47, %v604_v45  ;;  %v607_v56 = vsel %vm606_vm4, %v604_v45, %v605_v52  ;;  %v708_v59 = vsel %vm706_vm5, %v703_v57, %v704_v54  ;;  %v1004_v14 = vrot.slane %v1922_v30, 7 }
  0xd5   : > { %1514 = vmatmul.mubr.msk.f32.vlgmr.msra.gmra.mxu1 %vm291_vm0, %v1917_v26  ;;  %1523 = vmatpush3.msra.mxu0 %v512_v35  ;;  %v707_v1 = vsel %vm706_vm5, %v704_v54, %v705_v62  ;;  %v808_v2 = vsel %vm806_vm6, %v803_v63, %v804_v61  ;;  %v807_v8 = vsel %vm806_vm6, %v804_v61, %v805_v4  ;;  %v905_v15 = vrot.slane %v1915_v24, 6 }
  0xd6   : > { %1503 = vmatprep.mubr.msk.f32.mxu0 %vm1787_vm1, %v1786_v9  ;;  %1516 = vmatprep.mubr.msk.f32.mxu1 %vm1787_vm1, %v1786_v9  ;;  %v908_v12 = vsel %vm906_vm7, %v903_v10, %v904_v6  ;;  %v1003_v16 = vrot.slane %v1917_v26, 7  ;;  %v1005_v20 = vrot.slane %v1915_v24, 7 }
  0xd7   : > { %1524 = vmatprep.subr.mxu0 %v1786_v9  ;;  %1535 = vmatprep.subr.mxu1 %v1786_v9  ;;  %v907_v18 = vsel %vm906_vm7, %v904_v6, %v905_v15  ;;  %v909_v21 = vsel %vm906_vm7, %v905_v15, %v903_v10 }
  0xd8   : > { %1504 = vmatmul.mubr.msk.f32.gmra.mxu0 %vm291_vm0, %v321_v39  ;;  %1536 = vmatpush3.msra.mxu1 %v612_v37  ;;  %v1008_v19 = vsel %vm1006_vm8, %v1003_v16, %v1004_v14  ;;  %v1007_v23 = vsel %vm1006_vm8, %v1004_v14, %v1005_v20  ;;  %v1009_v25 = vsel %vm1006_vm8, %v1005_v20, %v1003_v16 }
  0xd9   : > { %1517 = vmatmul.mubr.msk.f32.gmra.mxu1 %vm291_vm0, %v1922_v30  ;;  %1525 = vmatpush3.msra.mxu0 %v511_v38 }
  0xda   : > { %1519 = vmatprep.mubr.msk.f32.mxu1 %vm1787_vm1, %v1786_v9  ;;  %1526 = vmatprep.mubr.msk.f32.mxu0 %vm1787_vm1, %v1786_v9 }
  0xdb   : > { %1548 = vmatprep.subr.mxu0 %v1786_v9  ;;  %1537 = vmatprep.subr.mxu1 %v1786_v9 }
  0xdc   : > { %1527 = vmatmul.mubr.msk.f32.vlgmr.msra.gmra.mxu0 %vm291_vm0, %v508_v44  ;;  %1538 = vmatpush3.msra.mxu1 %v611_v42 }
  0xdd   : > { %1520 = vmatmul.mubr.msk.f32.gmra.mxu1 %vm291_vm0, %v1915_v24  ;;  %1549 = vmatpush3.msra.mxu0 %v712_v43 }
  0xde   : > { %1529 = vmatprep.mubr.msk.f32.mxu0 %vm1787_vm1, %v1786_v9  ;;  %1539 = vmatprep.mubr.msk.f32.mxu1 %vm1787_vm1, %v1786_v9 }
  0xdf   : > { %1550 = vmatprep.subr.mxu0 %v1786_v9  ;;  %1561 = vmatprep.subr.mxu1 %v1786_v9 }
  0xe0   : > { %1530 = vmatmul.mubr.msk.f32.gmra.mxu0 %vm291_vm0, %v507_v49 }
  0xe1   : > { %1540 = vmatmul.mubr.msk.f32.vlgmr.msra.gmra.mxu1 %vm291_vm0, %v608_v50  ;;  %1551 = vmatpush3.msra.mxu0 %v711_v48 }
  0xe2   : > { %1532 = vmatprep.mubr.msk.f32.mxu0 %vm1787_vm1, %v1786_v9  ;;  %1542 = vmatprep.mubr.msk.f32.mxu1 %vm1787_vm1, %v1786_v9 }
  0xe3   : > { %1562 = vmatpush3.msra.mxu1 %v812_v51  ;;  %1574 = vmatprep.subr.mxu0 %v1786_v9 }
  0xe4   : > { %1533 = vmatmul.mubr.msk.f32.gmra.mxu0 %vm291_vm0, %v509_v53  ;;  %1563 = vmatprep.subr.mxu1 %v1786_v9 }
  0xe5   : > { %1543 = vmatmul.mubr.msk.f32.gmra.mxu1 %vm291_vm0, %v607_v56  ;;  %1552 = vmatprep.mubr.msk.f32.mxu0 %vm1787_vm1, %v1786_v9 }
  0xe6   : > { %1545 = vmatprep.mubr.msk.f32.mxu1 %vm1787_vm1, %v1786_v9  ;;  %1564 = vmatpush3.msra.mxu1 %v811_v55 }
  0xe7   : > { %1587 = vmatprep.subr.mxu1 %v1786_v9 }
  0xe8   : > { %1553 = vmatmul.mubr.msk.f32.vlgmr.msra.gmra.mxu0 %vm291_vm0, %v708_v59 }
  0xe9   : > { %1546 = vmatmul.mubr.msk.f32.gmra.mxu1 %vm291_vm0, %v609_v60  ;;  %1575 = vmatpush3.msra.mxu0 %v912_v58 }
  0xea   : > { %1555 = vmatprep.mubr.msk.f32.mxu0 %vm1787_vm1, %v1786_v9  ;;  %1565 = vmatprep.mubr.msk.f32.mxu1 %vm1787_vm1, %v1786_v9 }
  0xeb   : > { %1576 = vmatprep.subr.mxu0 %v1786_v9 }
  0xec   : > { %1556 = vmatmul.mubr.msk.f32.gmra.mxu0 %vm291_vm0, %v707_v1 }
  0xed   : > { %1566 = vmatmul.mubr.msk.f32.vlgmr.msra.gmra.mxu1 %vm291_vm0, %v808_v2  ;;  %1577 = vmatpush3.msra.mxu0 %v911_v0 }
  0xee   : > { %1558 = vmatprep.mubr.msk.f32.mxu0 %vm1787_vm1, %v1786_v9  ;;  %1568 = vmatprep.mubr.msk.f32.mxu1 %vm1787_vm1, %v1786_v9 }
  0xef   : > { %1588 = vmatpush3.msra.mxu1 %v1012_v3  ;;  %1600 = vmatprep.subr.mxu0 %v1786_v9 }
  0xf0   : > { %1559 = vmatmul.mubr.msk.f32.gmra.mxu0 %vm291_vm0, %v709_v5  ;;  %1589 = vmatprep.subr.mxu1 %v1786_v9 }
  0xf1   : > { %1569 = vmatmul.mubr.msk.f32.gmra.mxu1 %vm291_vm0, %v807_v8  ;;  %1578 = vmatprep.mubr.msk.f32.mxu0 %vm1787_vm1, %v1786_v9 }
  0xf2   : > { %1571 = vmatprep.mubr.msk.f32.mxu1 %vm1787_vm1, %v1786_v9  ;;  %1590 = vmatpush3.msra.mxu1 %v1011_v7 }
  0xf3   : > { %1613 = vmatprep.subr.mxu1 %v1201_v22 }
  0xf4   : > { %1579 = vmatmul.mubr.msk.f32.vlgmr.msra.gmra.mxu0 %vm291_vm0, %v908_v12 }
  0xf5   : > { %1572 = vmatmul.mubr.msk.f32.gmra.mxu1 %vm291_vm0, %v809_v13  ;;  %1601 = vmatpush3.msra.mxu0 %v1105_v11 }
  0xf6   : > { %1581 = vmatprep.mubr.msk.f32.mxu0 %vm1787_vm1, %v1786_v9  ;;  %1591 = vmatprep.mubr.msk.f32.mxu1 %vm1787_vm1, %v1786_v9 }
  0xf7   : > { %1602 = vmatprep.subr.mxu0 %v1786_v9 }
  0xf8   : > { %1582 = vmatmul.mubr.msk.f32.gmra.mxu0 %vm291_vm0, %v907_v18 }
  0xf9   : > { %1592 = vmatmul.mubr.msk.f32.vlgmr.msra.gmra.mxu1 %vm291_vm0, %v1008_v19  ;;  %1603 = vmatpush3.msra.mxu0 %v1104_v17 }
  0xfa   : > { %1584 = vmatprep.mubr.msk.f32.mxu0 %vm1787_vm1, %v1786_v9  ;;  %1594 = vmatprep.mubr.msk.f32.mxu1 %vm1787_vm1, %v1786_v9 }
  0xfb   : > { %1614 = vmatpush3.msra.mxu1 %v1201_v22 }
  0xfc   : > { %1585 = vmatmul.mubr.msk.f32.gmra.mxu0 %vm291_vm0, %v909_v21  ;;  %1615 = vmatprep.subr.mxu1 %v1200_v27 }
  0xfd   : > { %1595 = vmatmul.mubr.msk.f32.gmra.mxu1 %vm291_vm0, %v1007_v23  ;;  %1604 = vmatprep.mubr.msk.f32.mxu0 %vm1787_vm1, %v1786_v9 }
  0xfe   : > { %1597 = vmatprep.mubr.msk.f32.mxu1 %vm1787_vm1, %v1786_v9  ;;  %1616 = vmatpush3.msra.mxu1 %v1200_v27 }
 0x100   : > { %1605 = vmatmul.mubr.msk.f32.vlgmr.msra.gmra.mxu0 %vm291_vm0, %v1922_v30 }
 0x101   : > { %1598 = vmatmul.mubr.msk.f32.gmra.mxu1 %vm291_vm0, %v1009_v25  ;;  %1607 = vmatprep.mubr.msk.f32.mxu0 %vm1787_vm1, %v1786_v9  ;;  %v1434_v25 = vld [vmem:[%s2158_s3] ss:$0 sm:$0xff] }
 0x104   : > { %1608 = vmatmul.mubr.msk.f32.gmra.mxu0 %vm291_vm0, %v1915_v24  ;;  %v1199_v24 = vld [vmem:[%s2159_s4 + $0x8] sm:$0xff] }
 0x105   : > { %1610 = vmatprep.mubr.msk.f32.mxu0 %vm1787_vm1, %v1786_v9  ;;  %v1198_v9 = vld [vmem:[%s2159_s4] sm:$0xff]  ;;  %1617 = vmatprep.subr.mxu1 %v1199_v24 }
 0x106   : > { %1618 = vmatpush3.msra.mxu1 %v1199_v24 }
 0x107   : > { %1619 = vmatprep.subr.mxu1 %v1198_v9 }
 0x108   : > { %1611 = vmatmul.mubr.msk.f32.gmra.mxu0 %vm291_vm0, %v1917_v26  ;;  %1620 = vmatpush3.msra.mxu1 %v1198_v9 }
 0x191   : > { %v412_v26 = vpop.f32.mrf.mxu1 }
 0x193   : > { %v1508_v28 = vpop.f32.mrf.mxu1 }
 0x194   : > { %v402_v29 = vpop.f32.mrf.mxu0 }
 0x195   : > { %v490_v30 = vpop.f32.mrf.mxu1 }
 0x196   : > { %v1502_v31 = vpop.f32.mrf.mxu0  ;;  %v491_v60 = vadd.f32 %v490_v30, %v402_v29 }
 0x197   : > { %v1515_v32 = vpop.f32.mrf.mxu1 }
 0x198   : > { %v407_v33 = vpop.f32.mrf.mxu0 }
 0x199   : > { %v495_v34 = vpop.f32.mrf.mxu1 }
 0x19a   : > { %v1505_v35 = vpop.f32.mrf.mxu0  ;;  %v496_v2 = vadd.f32 %v495_v34, %v407_v33 }
 0x19b   : > { %v1518_v36 = vpop.f32.mrf.mxu1 }
 0x19c   : > { %v588_v37 = vpop.f32.mrf.mxu0 }
 0x19d   : > { %v500_v38 = vpop.f32.mrf.mxu1  ;;  %v601_v63 = vadd.f32 %v588_v37, %v491_v60 }
 0x19e   : > { %v1528_v39 = vpop.f32.mrf.mxu0  ;;  %v1435_v38 = vld [vmem:[%s2160_s5] ss:$0 sm:$0xff] }
 0x19f   : > { %v1521_v40 = vpop.f32.mrf.mxu1 }
 0x1a0   : > { %v593_v41 = vpop.f32.mrf.mxu0  ;;  %v1292_v40 = vld [vmem:[%s279_s29 + $0x8] sm:$0xff] }
 0x1a1   : > { %v688_v42 = vpop.f32.mrf.mxu1  ;;  %v602_v6 = vadd.f32 %v593_v41, %v496_v2 }
 0x1a2   : > { %v1531_v43 = vpop.f32.mrf.mxu0  ;;  %v701_v3 = vadd.f32 %v688_v42, %v601_v63 }
 0x1a3   : > { %v1541_v44 = vpop.f32.mrf.mxu1  ;;  %v1291_v43 = vld [vmem:[%s279_s29] sm:$0xff] }
 0x1a4   : > { %v598_v45 = vpop.f32.mrf.mxu0 }
 0x1a5   : > { %v693_v46 = vpop.f32.mrf.mxu1 }
 0x1a6   : > { %v1534_v47 = vpop.f32.mrf.mxu0  ;;  %v702_v11 = vadd.f32 %v693_v46, %v602_v6 }
 0x1a7   : > { %v1544_v48 = vpop.f32.mrf.mxu1 }
 0x1a8   : > { %v788_v49 = vpop.f32.mrf.mxu0 }
 0x1a9   : > { %v698_v50 = vpop.f32.mrf.mxu1  ;;  %v801_v7 = vadd.f32 %v788_v49, %v701_v3 }
 0x1aa   : > { %v1554_v51 = vpop.f32.mrf.mxu0 }
 0x1ab   : > { %v1547_v52 = vpop.f32.mrf.mxu1 }
 0x1ac   : > { %v793_v53 = vpop.f32.mrf.mxu0 }
 0x1ad   : > { %v888_v54 = vpop.f32.mrf.mxu1  ;;  %v802_v15 = vadd.f32 %v793_v53, %v702_v11 }
 0x1ae   : > { %v1557_v55 = vpop.f32.mrf.mxu0  ;;  %v901_v12 = vadd.f32 %v888_v54, %v801_v7 }
 0x1af   : > { %v1567_v56 = vpop.f32.mrf.mxu1 }
 0x1b0   : > { %v798_v57 = vpop.f32.mrf.mxu0 }
 0x1b1   : > { %v893_v58 = vpop.f32.mrf.mxu1 }
 0x1b2   : > { %v1560_v59 = vpop.f32.mrf.mxu0  ;;  %v902_v19 = vadd.f32 %v893_v58, %v802_v15 }
 0x1b3   : > { %v1570_v61 = vpop.f32.mrf.mxu1 }
 0x1b4   : > { %v988_v62 = vpop.f32.mrf.mxu0 }
 0x1b5   : > { %v898_v0 = vpop.f32.mrf.mxu1  ;;  %v1001_v16 = vadd.f32 %v988_v62, %v901_v12 }
 0x1b6   : > { %v1580_v1 = vpop.f32.mrf.mxu0 }
 0x1b7   : > { %v1573_v4 = vpop.f32.mrf.mxu1 }
 0x1b8   : > { %v993_v5 = vpop.f32.mrf.mxu0 }
 0x1b9   : > { %v1088_v8 = vpop.f32.mrf.mxu1  ;;  %v1002_v22 = vadd.f32 %v993_v5, %v902_v19 }
 0x1ba   : > { %v1583_v10 = vpop.f32.mrf.mxu0  ;;  %v1101_v20 = vadd.f32 %v1088_v8, %v1001_v16 }
 0x1bb   : > { %v1593_v13 = vpop.f32.mrf.mxu1 }
 0x1bc   : > { %v998_v14 = vpop.f32.mrf.mxu0 }
 0x1bd   : > { %v1093_v17 = vpop.f32.mrf.mxu1 }
 0x1be   : > { %v1586_v18 = vpop.f32.mrf.mxu0  ;;  %v1102_v26 = vadd.f32 %v1093_v17, %v1002_v22 }
 0x1bf   : > { %v1596_v21 = vpop.f32.mrf.mxu1 }
 0x1c0   : > { %v1172_v23 = vpop.f32.mrf.mxu0 }
 0x1c1   : > { %v1098_v27 = vpop.f32.mrf.mxu1  ;;  %v1185_v24 = vadd.f32 %v1172_v23, %v1101_v20 }
 0x1c2   : > { %v1606_v9 = vpop.f32.mrf.mxu0 }
 0x1c3   : > { %v1194_v28 = vadd.f32 %v1434_v25, %v1185_v24  ;;  %v1599_v29 = vpop.f32.mrf.mxu1 }
 0x1c4   : > { %v1177_v30 = vpop.f32.mrf.mxu0 }
 0x1c5   : > { %v1196_v31 = vmax.f32 %v1194_v28, 0.0  ;;  %v1186_v32 = vadd.f32 %v1177_v30, %v1102_v26 }
 0x1c6   : > { %v1609_v33 = vpop.f32.mrf.mxu0 }
 0x1c7   : > { %v1195_v34 = vadd.f32 %v1434_v25, %v1186_v32  ;;  %1621 = vmatprep.mubr.msk.f32.mxu1 %vm1209_vm9, %v1196_v31 }
 0x1c8   : > { %v1182_v35 = vpop.f32.mrf.mxu0 }
 0x1c9   : > { %v1197_v36 = vmax.f32 %v1195_v34, 0.0 }
 0x1ca   : > { %v1612_v37 = vpop.f32.mrf.mxu0 }
 0x1cb   : > { %1622 = vmatmul.mubr.msk.f32.vlgmr.msra.gmra.mxu1 %vm1209_vm9, %v1197_v36 }
 0x28b   : > { %v1623_v39 = vpop.f32.mrf.mxu1 }
 0x28c   : > { %v1288_v41 = vadd.f32 %v1623_v39, %v1435_v38 }
 0x28d   : > { %v1282_v42 = vpop.f32.mrf.mxu1 }
 0x28e   : > { %v1294_v44 = vadd.f32 %v1292_v40, %v1288_v41  ;;  %v1283_v45 = vadd.f32 %v1435_v38, %v1282_v42 }
 0x290   : > { %1296 = vst.msk [vmem:[%s274_s12 + $0x8] sm:$0xff] %vm291_vm0, %v1294_v44  ;;  %v1293_v46 = vadd.f32 %v1291_v43, %v1283_v45 }
 0x292   : > { %1295 = vst.msk [vmem:[%s274_s12] sm:$0xff] %vm291_vm0, %v1293_v46 }
 0x293   : > { %1730 = shalt.err (!%p1727_p0)
}
 0x294   : > { %s1731_s18 = scalar_lea.hbm %s2109_s15, 256  ;;  %s1735_s9 = scalar_lea.hbm %s2161_s6, 512 }
 0x295   : > { %p1732_p1 = scmp.ne.s32.totalorder %s2109_s15, %s1731_s18  ;;  %p1736_p4 = scmp.lt.s32.totalorder %s2109_s15, %s2161_s6 }
 0x296   : > { %p1737_p7 = scmp.lt.s32.totalorder %s1735_s9, %s1731_s18 }
 0x297   : > { %p1733_p2 = pnand %p1732_p1, %p1864_p5 }
 0x298   : > { %p1738_p8 = por %p1737_p7, %p1736_p4 }
 0x299   : > { %p1734_p3 = pneg %p1733_p2 }
 0x29b   : > { %p1739_p6 = pnand %p1738_p8, %p1734_p3 }
 0x29d   : > { %1742 = shalt.err (!%p1739_p6)
}
 0x29e   : > { %s1789_s12 = smov 128   ;;  %s1790_s17 = smov 8  }
 0x29f   : > { %1633 = dma.vmem_to_hbm [thread:$0]  (%p1864_p5), %s2111_s13, 256, %s2109_s15, %s2115_s25, %s1789_s12, %s1789_s12, %s1790_s17  }
 0x2a0 PF: > { %p1645_p9 = scmp.ge.s32.totalorder %s1781_s24, 2  ;;  %s1326_s14 = sand.u32 1, %s1769_s21  }
 0x2a1   : > { %p2165_p10 = scmp.ne.s32.totalorder %s2163_s8, 0  ;;  %s1327_s16 = scalar_lea.sflag [#allocation4], %s1326_s14 }
 0x2a3   : > { %p1640_p11 = pnand %p1645_p9, %p2165_p10 }
 0x2a5   : > { %p1641_p12 = pneg %p1640_p11 }
 0x2a7   : > { %1764 = dma.done.wait (%p1641_p12), %s1327_s16, 256  }
 0x2a8   : > { %1766 = vsyncadd (%p1641_p12), %s1327_s16, 4294967040  ;;  %p17_p13 = scmp.ge.s32.totalorder %s1851_s27, 4   ;;  %s2166_s21 = smov %s1773_s22 }
 0x2a9   : > { %s2167_s22 = smov %s1777_s23  ;;  %s2168_s23 = smov %s1862_s30 }
 0x2aa   : > { %s2169_s24 = smov %s1851_s27  ;;  %19 = sbr.rel (!%p17_p13) target bundleno = 4 (0x4), region = 95 }
 0x2af   :  { %1332 = vsyncpa [#allocation3], 1 }
 0x2b0   :  { %1334 = vsyncpa [#allocation3 + $0x1], 1 }
 0x2b1   :  { %1335 = vsyncpa [#allocation4], 1 }
 0x2b2   :  { %1337 = vsyncpa [#allocation4 + $0x1], 1 }

</bundles_post_ra>
